<compile_context>
chip_gen: v7x
topology: tpu7x:2x2x1
jax: 0.10.0
libtpu: 0.0.40
codegen_flags: <defaults>
</compile_context>

<pallas_src>
import functools

import jax
import jax.numpy as jnp
from jax import lax
from jax.experimental import pallas as pl
from jax.experimental.pallas import tpu as pltpu

BN_EPS = 1e-5
LANE = 128


def _round_up(n, m=LANE):
    return ((n + m - 1) // m) * m


def _actor_kernel(x_ref, w_ref, vec_ref, out_ref, *,
                  s_pad, f_pad, f1_pad, a_pad):
    x = x_ref[...]                                                    # (B, Sp)

    # Static sub-views of the packed weight slab.  Row offsets (0, Sp, Sp+Fp)
    # are multiples of 8 sublanes and column widths are multiples of 128
    # lanes, so these slices are layout-clean (no VMEM copies).
    r1 = s_pad
    r2 = s_pad + f_pad
    w1 = w_ref[0:r1, 0:f_pad]                                         # (Sp, Fp)
    w2 = w_ref[r1:r2, 0:f1_pad]                                       # (Fp, F1p)
    w3 = w_ref[r2:r2 + f1_pad, 0:a_pad]                               # (F1p, Ap)

    # Static lane-aligned slices of the packed per-feature vector.
    g1 = vec_ref[:, 0:f_pad]
    be1 = vec_ref[:, f_pad:2 * f_pad]
    g2 = vec_ref[:, 2 * f_pad:2 * f_pad + f1_pad]
    be2 = vec_ref[:, 2 * f_pad + f1_pad:2 * f_pad + 2 * f1_pad]
    b3 = vec_ref[:, 2 * f_pad + 2 * f1_pad:2 * f_pad + 2 * f1_pad + a_pad]

    def bn_relu(h, g, be, width):
        # ONE batch-axis reduction for both mu and E[h^2].
        stats = jnp.mean(jnp.concatenate([h, h * h], axis=1),
                         axis=0, keepdims=True)                       # (1, 2W)
        mu = stats[:, :width]
        ex2 = stats[:, width:]
        var = jnp.maximum(ex2 - mu * mu, 0.0)
        scale = lax.rsqrt(var + BN_EPS) * g                           # (1, W)
        shift = be - mu * scale                                       # (1, W)
        # Only two VALU passes over the (B, W) tile: mul+add, then max.
        return jnp.maximum(h * scale + shift, 0.0)

    # ---- fc1 + bn1 + relu (fc1 bias cancelled by batch-mean subtraction) --
    h = jnp.dot(x, w1, preferred_element_type=jnp.float32)            # (B, Fp)
    h = bn_relu(h, g1, be1, f_pad)

    # ---- fc2 + bn2 + relu (fc2 bias likewise omitted) ----------------------
    h = jnp.dot(h, w2, preferred_element_type=jnp.float32)            # (B, F1p)
    h = bn_relu(h, g2, be2, f1_pad)

    # ---- fc3 + tanh (lane-dense padded output) -----------------------------
    o = jnp.dot(h, w3, preferred_element_type=jnp.float32) + b3
    out_ref[...] = jnp.tanh(o)


def pack_actor_params(params):
    """Pad weights to lane-dense widths, pack them into ONE slab, and pack the
    small per-feature vectors into ONE (1, N) array.

    Do this ONCE per parameter set, not per forward call.
    """
    w1, w2, w3 = params["w1"], params["w2"], params["w3"]
    S, F = w1.shape
    F1 = w2.shape[1]
    A = w3.shape[1]
    Sp = _round_up(S, 8)
    Fp, F1p, Ap = _round_up(F), _round_up(F1), _round_up(A)
    Wp = max(Fp, F1p, Ap)          # common lane width of the packed weight slab

    def pad2(w, rows, cols):
        return jnp.pad(w, ((0, rows - w.shape[0]), (0, cols - w.shape[1])))

    # One (Sp + Fp + F1p, Wp) f32 slab; single pallas_call input.
    w_packed = jnp.concatenate(
        [pad2(w1, Sp, Wp), pad2(w2, Fp, Wp), pad2(w3, F1p, Wp)], axis=0)

    def pad_vec(v, n):
        v = v.reshape(1, -1)
        return jnp.pad(v, ((0, 0), (0, n - v.shape[1])))   # zero-pad (invariant)

    # b1/b2 intentionally excluded: cancelled by training-mode BatchNorm.
    vec = jnp.concatenate(
        [pad_vec(params["g1"], Fp), pad_vec(params["be1"], Fp),
         pad_vec(params["g2"], F1p), pad_vec(params["be2"], F1p),
         pad_vec(params["b3"], Ap)], axis=1)

    dims = {"s_pad": Sp, "f_pad": Fp, "f1_pad": F1p, "a_pad": Ap,
            "state_size": S, "action_size": A}
    return (w_packed, vec), dims


def actor_forward(state, packed, dims):
    """state: (B, state_size) float32; packed/dims from pack_actor_params.

    The whole batch lives in one block because BN statistics couple it; to
    amortize the fixed launch cost, grow B per call rather than adding a grid.
    """
    w_packed, vec = packed
    B, S = state.shape
    Sp = dims["s_pad"]
    if Sp != S:
        state = jnp.pad(state, ((0, 0), (0, Sp - S)))

    kernel = functools.partial(_actor_kernel, s_pad=Sp,
                               f_pad=dims["f_pad"], f1_pad=dims["f1_pad"],
                               a_pad=dims["a_pad"])
    out = pl.pallas_call(
        kernel,
        out_shape=jax.ShapeDtypeStruct((B, dims["a_pad"]), jnp.float32),
        in_specs=[pl.BlockSpec(memory_space=pltpu.VMEM)] * 3,
        out_specs=pl.BlockSpec(memory_space=pltpu.VMEM),
    )(state, w_packed, vec)
    return out[:, :dims["action_size"]]


def init_actor_params(key, state_size, action_size, fc_units, fc1_units):
    """Deterministic init mirroring Actor.__init__ + reset_parameters."""
    ks = jax.random.split(key, 6)

    def uni(k, shape, bound):
        return jax.random.uniform(k, shape, jnp.float32, -bound, bound)

    # fc1: default Linear init, weight/bias ~ U(-1/sqrt(in), 1/sqrt(in))
    b1_bound = 1.0 / jnp.sqrt(jnp.float32(state_size))
    w1 = uni(ks[0], (state_size, fc_units), b1_bound)       # stored (in, out)
    b1 = uni(ks[1], (1, fc_units), b1_bound)

    # fc2: reset_parameters -> weight ~ U(-0.0015, 0.0015); bias stays default
    b2_bound = 1.0 / jnp.sqrt(jnp.float32(fc_units))
    w2 = uni(ks[2], (fc_units, fc1_units), 0.0015)
    b2 = uni(ks[3], (1, fc1_units), b2_bound)

    # fc3: reset_parameters -> weight ~ U(-0.003, 0.003); bias stays default
    b3_bound = 1.0 / jnp.sqrt(jnp.float32(fc1_units))
    w3 = uni(ks[4], (fc1_units, action_size), 0.003)
    b3 = uni(ks[5], (1, action_size), b3_bound)

    return {
        "w1": w1, "b1": b1,
        "g1": jnp.ones((1, fc_units), jnp.float32),
        "be1": jnp.zeros((1, fc_units), jnp.float32),
        "w2": w2, "b2": b2,
        "g2": jnp.ones((1, fc1_units), jnp.float32),
        "be2": jnp.zeros((1, fc1_units), jnp.float32),
        "w3": w3, "b3": b3,
    }


def actor_reference(state, params):
    """Pure-JAX reference (keeps b1/b2 — BN cancels them, so outputs match)."""
    def bn(h, g, be):
        mu = jnp.mean(h, axis=0, keepdims=True)
        var = jnp.mean((h - mu) ** 2, axis=0, keepdims=True)
        return (h - mu) / jnp.sqrt(var + BN_EPS) * g + be

    h = state @ params["w1"] + params["b1"]
    h = jnp.maximum(bn(h, params["g1"], params["be1"]), 0.0)
    h = h @ params["w2"] + params["b2"]
    h = jnp.maximum(bn(h, params["g2"], params["be2"]), 0.0)
    return jnp.tanh(h @ params["w3"] + params["b3"])


if __name__ == "__main__":
    # Small shapes consistent with the module's forward.
    B, STATE, ACTION = 8, 16, 8
    FC_UNITS, FC1_UNITS = 64, 32

    key = jax.random.PRNGKey(0)
    k_state, k_params = jax.random.split(key)
    state = jax.random.normal(k_state, (B, STATE), jnp.float32)
    params = init_actor_params(k_params, STATE, ACTION, FC_UNITS, FC1_UNITS)

    packed, dims = pack_actor_params(params)          # one-time packing
    out = actor_forward(state, packed, dims)
    out = jax.block_until_ready(out)

    # sanity: shape, tanh range, and agreement with pure-JAX reference
    assert out.shape == (B, ACTION)
    assert bool(jnp.all(jnp.abs(out) <= 1.0))
    ref = actor_reference(state, params)
    assert bool(jnp.allclose(out, ref, atol=1e-4, rtol=1e-4))
    print("KERNEL_OK")
</pallas_src>

<mosaic_0001>
module attributes {stable_mosaic.version = 11 : i64} {
  func.func @_actor_kernel(%arg0: memref<8x16xf32, #tpu.memory_space<vmem>>, %arg1: memref<272x128xf32, #tpu.memory_space<vmem>>, %arg2: memref<1x640xf32, #tpu.memory_space<vmem>>, %arg3: memref<8x128xf32, #tpu.memory_space<vmem>>) attributes {dimension_semantics = [], scalar_prefetch = 0 : i64, scratch_operands = 0 : i64, tpu.core_type = #tpu.core_type<tc>} {
    %c0 = arith.constant 0 : index
    %c0_0 = arith.constant 0 : index
    %0 = vector.load %arg0[%c0, %c0_0] : memref<8x16xf32, #tpu.memory_space<vmem>>, vector<8x16xf32>
    %c0_1 = arith.constant 0 : index
    %c0_2 = arith.constant 0 : index
    %1 = vector.load %arg1[%c0_1, %c0_2] : memref<272x128xf32, #tpu.memory_space<vmem>>, vector<16x128xf32>
    %c16 = arith.constant 16 : index
    %c0_3 = arith.constant 0 : index
    %2 = vector.load %arg1[%c16, %c0_3] : memref<272x128xf32, #tpu.memory_space<vmem>>, vector<128x128xf32>
    %c144 = arith.constant 144 : index
    %c0_4 = arith.constant 0 : index
    %3 = vector.load %arg1[%c144, %c0_4] : memref<272x128xf32, #tpu.memory_space<vmem>>, vector<128x128xf32>
    %c0_5 = arith.constant 0 : index
    %c0_6 = arith.constant 0 : index
    %4 = vector.load %arg2[%c0_5, %c0_6] : memref<1x640xf32, #tpu.memory_space<vmem>>, vector<1x128xf32>
    %c0_7 = arith.constant 0 : index
    %c128 = arith.constant 128 : index
    %5 = vector.load %arg2[%c0_7, %c128] : memref<1x640xf32, #tpu.memory_space<vmem>>, vector<1x128xf32>
    %c0_8 = arith.constant 0 : index
    %c256 = arith.constant 256 : index
    %6 = vector.load %arg2[%c0_8, %c256] : memref<1x640xf32, #tpu.memory_space<vmem>>, vector<1x128xf32>
    %c0_9 = arith.constant 0 : index
    %c384 = arith.constant 384 : index
    %7 = vector.load %arg2[%c0_9, %c384] : memref<1x640xf32, #tpu.memory_space<vmem>>, vector<1x128xf32>
    %c0_10 = arith.constant 0 : index
    %c512 = arith.constant 512 : index
    %8 = vector.load %arg2[%c0_10, %c512] : memref<1x640xf32, #tpu.memory_space<vmem>>, vector<1x128xf32>
    %cst = arith.constant dense<0.000000e+00> : vector<8x128xf32>
    %9 = tpu.matmul %0, %1, %cst {dimension_numbers = #tpu.dot_dimension_numbers<[1], [0], [0], [1], [0, 0, 1, 1], [], []>} : vector<8x16xf32>, vector<16x128xf32>, vector<8x128xf32> -> vector<8x128xf32>
    %10 = arith.mulf %9, %9 : vector<8x128xf32>
    %11 = tpu.concatenate %9, %10 in 1 : vector<8x128xf32>, vector<8x128xf32> -> vector<8x256xf32>
    %cst_11 = arith.constant dense<0.000000e+00> : vector<256xf32>
    %12 = vector.multi_reduction <add>, %11, %cst_11 [0] : vector<8x256xf32> to vector<256xf32>
    %13 = vector.shape_cast %12 : vector<256xf32> to vector<1x256xf32>
    %cst_12 = arith.constant 8.000000e+00 : f32
    %14 = vector.broadcast %cst_12 : f32 to vector<1x256xf32>
    %15 = arith.divf %13, %14 : vector<1x256xf32>
    %16 = vector.extract_strided_slice %15 {offsets = [0, 0], sizes = [1, 128], strides = [1, 1]} : vector<1x256xf32> to vector<1x128xf32>
    %17 = vector.extract_strided_slice %15 {offsets = [0, 128], sizes = [1, 128], strides = [1, 1]} : vector<1x256xf32> to vector<1x128xf32>
    %18 = arith.mulf %16, %16 : vector<1x128xf32>
    %19 = arith.subf %17, %18 : vector<1x128xf32>
    %cst_13 = arith.constant 0.000000e+00 : f32
    %20 = vector.broadcast %cst_13 : f32 to vector<1x128xf32>
    %21 = arith.maximumf %19, %20 : vector<1x128xf32>
    %cst_14 = arith.constant 9.99999974E-6 : f32
    %22 = vector.broadcast %cst_14 : f32 to vector<1x128xf32>
    %23 = arith.addf %21, %22 : vector<1x128xf32>
    %24 = math.rsqrt %23 : vector<1x128xf32>
    %25 = arith.mulf %24, %4 : vector<1x128xf32>
    %26 = arith.mulf %16, %25 : vector<1x128xf32>
    %27 = arith.subf %5, %26 : vector<1x128xf32>
    %28 = vector.broadcast %25 : vector<1x128xf32> to vector<8x128xf32>
    %29 = arith.mulf %9, %28 : vector<8x128xf32>
    %30 = vector.broadcast %27 : vector<1x128xf32> to vector<8x128xf32>
    %31 = arith.addf %29, %30 : vector<8x128xf32>
    %cst_15 = arith.constant 0.000000e+00 : f32
    %32 = vector.broadcast %cst_15 : f32 to vector<8x128xf32>
    %33 = arith.maximumf %31, %32 : vector<8x128xf32>
    %cst_16 = arith.constant dense<0.000000e+00> : vector<8x128xf32>
    %34 = tpu.matmul %33, %2, %cst_16 {dimension_numbers = #tpu.dot_dimension_numbers<[1], [0], [0], [1], [0, 0, 1, 1], [], []>} : vector<8x128xf32>, vector<128x128xf32>, vector<8x128xf32> -> vector<8x128xf32>
    %35 = arith.mulf %34, %34 : vector<8x128xf32>
    %36 = tpu.concatenate %34, %35 in 1 : vector<8x128xf32>, vector<8x128xf32> -> vector<8x256xf32>
    %cst_17 = arith.constant dense<0.000000e+00> : vector<256xf32>
    %37 = vector.multi_reduction <add>, %36, %cst_17 [0] : vector<8x256xf32> to vector<256xf32>
    %38 = vector.shape_cast %37 : vector<256xf32> to vector<1x256xf32>
    %cst_18 = arith.constant 8.000000e+00 : f32
    %39 = vector.broadcast %cst_18 : f32 to vector<1x256xf32>
    %40 = arith.divf %38, %39 : vector<1x256xf32>
    %41 = vector.extract_strided_slice %40 {offsets = [0, 0], sizes = [1, 128], strides = [1, 1]} : vector<1x256xf32> to vector<1x128xf32>
    %42 = vector.extract_strided_slice %40 {offsets = [0, 128], sizes = [1, 128], strides = [1, 1]} : vector<1x256xf32> to vector<1x128xf32>
    %43 = arith.mulf %41, %41 : vector<1x128xf32>
    %44 = arith.subf %42, %43 : vector<1x128xf32>
    %cst_19 = arith.constant 0.000000e+00 : f32
    %45 = vector.broadcast %cst_19 : f32 to vector<1x128xf32>
    %46 = arith.maximumf %44, %45 : vector<1x128xf32>
    %cst_20 = arith.constant 9.99999974E-6 : f32
    %47 = vector.broadcast %cst_20 : f32 to vector<1x128xf32>
    %48 = arith.addf %46, %47 : vector<1x128xf32>
    %49 = math.rsqrt %48 : vector<1x128xf32>
    %50 = arith.mulf %49, %6 : vector<1x128xf32>
    %51 = arith.mulf %41, %50 : vector<1x128xf32>
    %52 = arith.subf %7, %51 : vector<1x128xf32>
    %53 = vector.broadcast %50 : vector<1x128xf32> to vector<8x128xf32>
    %54 = arith.mulf %34, %53 : vector<8x128xf32>
    %55 = vector.broadcast %52 : vector<1x128xf32> to vector<8x128xf32>
    %56 = arith.addf %54, %55 : vector<8x128xf32>
    %cst_21 = arith.constant 0.000000e+00 : f32
    %57 = vector.broadcast %cst_21 : f32 to vector<8x128xf32>
    %58 = arith.maximumf %56, %57 : vector<8x128xf32>
    %cst_22 = arith.constant dense<0.000000e+00> : vector<8x128xf32>
    %59 = tpu.matmul %58, %3, %cst_22 {dimension_numbers = #tpu.dot_dimension_numbers<[1], [0], [0], [1], [0, 0, 1, 1], [], []>} : vector<8x128xf32>, vector<128x128xf32>, vector<8x128xf32> -> vector<8x128xf32>
    %60 = vector.broadcast %8 : vector<1x128xf32> to vector<8x128xf32>
    %61 = arith.addf %59, %60 : vector<8x128xf32>
    %62 = math.tanh %61 : vector<8x128xf32>
    %c0_23 = arith.constant 0 : index
    %c0_24 = arith.constant 0 : index
    %63 = vector.load %arg3[%c0_23, %c0_24] : memref<8x128xf32, #tpu.memory_space<vmem>>, vector<8x128xf32>
    tpu.vector_store %arg3[%c0_23, %c0_24], %62 {strides = array<i32>} : memref<8x128xf32, #tpu.memory_space<vmem>>, vector<8x128xf32>,
    return
  }
}

</mosaic_0001>

<bundles_post_ra>
// kernel: tpu_custom_call.1
= control target key start
LH: loop header
LB: loop body
LE: loop exit
PB: predicated region body
PF: predicated region fallthrough
CT: control target
= control target key end

     0   :  { %8 = vsyncpa [#allocation3], 0  ;;  %s754_s0 = inlined_call_operand.hbm [shape: f32[8,16], index: 0, kind: input, shape index: {}]   ;;  %s755_s1 = inlined_call_operand.hbm [shape: f32[272,128], index: 1, kind: input, shape index: {}]   ;;  %s756_s2 = inlined_call_operand.vmem [shape: f32[1,640], index: 2, kind: input, shape index: {}]   ;;  %s757_s3 = inlined_call_operand.hbm [shape: f32[8,128], index: 3, kind: output, shape index: {}]  }
   0x1   :  { %9 = vsyncpa [#allocation6], 0 }
   0x2   :  { %10 = vsyncpa [#allocation4], 0  ;;  %s645_s12 = smov [#allocation2]   ;;  %s646_s14 = smov [#allocation5]  }
   0x3   :  { %s17_s13 = sshll.u32 %s645_s12, 4  ;;  %s26_s15 = sshll.u32 %s646_s14, 4  ;;  %s18_s13 = int_to_ptr.vmem [resolvable:$true] %s17_s13  ;;  %s673_s15 = int_to_ptr.vmem [resolvable:$true] %s26_s15 }
   0x4   :  { %s573_s18 = scalar_lea.hbm %s754_s0, 128 }
   0x5   :  { %p574_p0 = scmp.ne.s32.totalorder %s754_s0, %s573_s18  ;;  %p577_p1 = scmp.lt.u32.totalorder %s573_s18, %s754_s0 }
   0x7   :  { %p579_p2 = pnand %p577_p1, %p574_p0 }
   0x9   :  { %582 = shalt.err (!%p579_p2)
}
   0xa   :  { %s583_s23 = scalar_lea.vmem %s18_s13, 128  ;;  %p588_p4 = scmp.lt.s32.totalorder %s18_s13, %s18_s13 }
   0xb   :  { %p584_p3 = scmp.ne.s32.totalorder %s18_s13, %s583_s23  ;;  %p589_p5 = scmp.lt.s32.totalorder %s583_s23, %s583_s23 }
   0xd   :  { %p590_p6 = por %p589_p5, %p588_p4 }
   0xf   :  { %p591_p7 = pnand %p590_p6, %p584_p3 }
  0x11   :  { %594 = shalt.err (!%p591_p7)
}
  0x12   :  { %20 = dma.hbm_to_vmem [thread:$0]  %s754_s0, 128, %s18_s13, [#allocation3]  }
  0x13   :  { %s595_s28 = scalar_lea.hbm %s755_s1, 4352 }
  0x14   :  { %p596_p8 = scmp.ne.s32.totalorder %s755_s1, %s595_s28  ;;  %p599_p9 = scmp.lt.u32.totalorder %s595_s28, %s755_s1 }
  0x16   :  { %p601_p10 = pnand %p599_p9, %p596_p8 }
  0x18   :  { %604 = shalt.err (!%p601_p10)
}
  0x19   :  { %s605_s6 = scalar_lea.vmem %s673_s15, 4352  ;;  %p610_p12 = scmp.lt.s32.totalorder %s673_s15, %s673_s15 }
  0x1a   :  { %p606_p11 = scmp.ne.s32.totalorder %s673_s15, %s605_s6  ;;  %p611_p13 = scmp.lt.s32.totalorder %s605_s6, %s605_s6 }
  0x1c   :  { %p612_p0 = por %p611_p13, %p610_p12 }
  0x1e   :  { %p613_p1 = pnand %p612_p0, %p606_p11 }
  0x20   :  { %616 = shalt.err (!%p613_p1)
}
  0x21   :  { %s647_s0 = smov 128   ;;  %s648_s7 = smov 8  }
  0x22   :  { %32 = dma.hbm_to_vmem [thread:$0]  %s755_s1, 4352, %s673_s15, [#allocation6], %s647_s0, %s647_s0, %s648_s7  }
  0x23   :  { %639 = dma.done.wait [#allocation3], 128  }
  0x24   :  { %640 = vsyncadd [#allocation3], 4294967168 }
  0x25   :  { %641 = dma.done.wait [#allocation6], 4352  }
  0x26   :  { %642 = vsyncadd [#allocation6], 4294962944  ;;  %v649_v0 = vmov 0.0|0.0   ;;  %vm650_vm0 = vmmov 0   ;;  %v651_v1 = vmov 0.0   ;;  %v42_v2 = vld [vmem:[#allocation5] sm:$0xff]  ;;  %v179_v51 = vlaneseq }
  0x27   :  { %508 = vmatprep.subr.bf16.mxu0 %v649_v0  ;;  %435 = vmatprep.mubr.msk.f32.mxu0 %vm650_vm0, %v651_v1  ;;  %v43_v3 = vld [vmem:[#allocation5 + $0x8] sm:$0xff]  ;;  %v41_v5 = vld [vmem:[#allocation2] sm:$0xff]  ;;  %vm81_vm1 = vcmask 130048   ;;  %v44_v6 = vld [vmem:[#allocation5 + $0x10] sm:$0xff]  ;;  %s652_s19 = smov [#allocation7]  }
  0x28   :  { %511 = vmatprep.subr.bf16.mxu1 %v649_v0  ;;  %470 = vmatprep.mubr.msk.f32.mxu1 %vm650_vm0, %v651_v1  ;;  %v509_v4 = vpack.c.bf16 %v43_v3, %v42_v2  ;;  %v45_v7 = vld [vmem:[#allocation5 + $0x18] sm:$0xff]  ;;  %v46_v9 = vld [vmem:[#allocation5 + $0x20] sm:$0xff]  ;;  %v47_v10 = vld [vmem:[#allocation5 + $0x28] sm:$0xff]  ;;  %v180_v52 = vshrl.u32 %v179_v51, 7  ;;  %s382_s20 = sshll.u32 %s652_s19, 4  ;;  %s383_s20 = int_to_ptr.vmem [resolvable:$true] %s382_s20 }
  0x29   :  { %v512_v8 = vpack.c.bf16 %v45_v7, %v44_v6  ;;  %v515_v11 = vpack.c.bf16 %v47_v10, %v46_v9  ;;  %v48_v12 = vld [vmem:[#allocation5 + $0x30] sm:$0xff]  ;;  %v49_v13 = vld [vmem:[#allocation5 + $0x38] sm:$0xff]  ;;  %v50_v15 = vld [vmem:[#allocation5 + $0x40] sm:$0xff]  ;;  %s617_s21 = scalar_lea.vmem %s383_s20, 128  ;;  %p622_p3 = scmp.lt.s32.totalorder %s383_s20, %s383_s20 }
  0x2a   :  { %510 = vmatpush3.bf16.msra.mxu0 %v509_v4  ;;  %v518_v14 = vpack.c.bf16 %v49_v13, %v48_v12  ;;  %v51_v16 = vld [vmem:[#allocation5 + $0x48] sm:$0xff]  ;;  %v52_v18 = vld [vmem:[#allocation5 + $0x50] sm:$0xff]  ;;  %v53_v19 = vld [vmem:[#allocation5 + $0x58] sm:$0xff]  ;;  %v717_v54 = vsub.s32 0, %v180_v52  ;;  %p618_p2 = scmp.ne.s32.totalorder %s383_s20, %s617_s21  ;;  %p623_p4 = scmp.lt.s32.totalorder %s617_s21, %s617_s21 }
  0x2b   :  { %535 = vmatprep.subr.bf16.mxu0 %v649_v0  ;;  %513 = vmatpush3.bf16.msra.mxu1 %v512_v8  ;;  %v521_v17 = vpack.c.bf16 %v51_v16, %v50_v15  ;;  %v524_v20 = vpack.c.bf16 %v53_v19, %v52_v18  ;;  %v54_v21 = vld [vmem:[#allocation5 + $0x60] sm:$0xff]  ;;  %v55_v22 = vld [vmem:[#allocation5 + $0x68] sm:$0xff]  ;;  %v56_v24 = vld [vmem:[#allocation5 + $0x70] sm:$0xff] }
  0x2c   :  { %514 = vmatprep.subr.bf16.mxu1 %v649_v0  ;;  %v527_v23 = vpack.c.bf16 %v55_v22, %v54_v21  ;;  %v57_v25 = vld [vmem:[#allocation5 + $0x78] sm:$0xff]  ;;  %v58_v27 = vld [vmem:[#allocation5 + $0x80] sm:$0xff]  ;;  %v59_v28 = vld [vmem:[#allocation5 + $0x88] sm:$0xff]  ;;  %p624_p5 = por %p623_p4, %p622_p3 }
  0x2d   :  { %436 = vmatmul.mubr.msk.f32.vlgmr.msra.gmra.mrb[0].mxu0 %vm81_vm1, %v41_v5  ;;  %v530_v26 = vpack.c.bf16 %v57_v25, %v56_v24  ;;  %v533_v29 = vpack.c.bf16 %v59_v28, %v58_v27  ;;  %v76_v53 = vld [vmem:[%s756_s2] sm:$0x1]  ;;  %v77_v57 = vld [vmem:[%s756_s2 + $0x1] sm:$0x1]  ;;  %v60_v2 = vld [vmem:[#allocation5 + $0x90] sm:$0xff] }
  0x2e   :  { %505 = vmatprep.mubr.msk.f32.mxu0 %vm650_vm0, %v651_v1  ;;  %v61_v3 = vld [vmem:[#allocation5 + $0x98] sm:$0xff]  ;;  %v62_v5 = vld [vmem:[#allocation5 + $0xa0] sm:$0xff]  ;;  %v63_v6 = vld [vmem:[#allocation5 + $0xa8] sm:$0xff]  ;;  %p625_p6 = pnand %p624_p5, %p618_p2 }
  0x2f   :  { %516 = vmatpush3.bf16.msra.mxu1 %v515_v11  ;;  %v536_v4 = vpack.c.bf16 %v61_v3, %v60_v2  ;;  %v539_v7 = vpack.c.bf16 %v63_v6, %v62_v5  ;;  %v64_v8 = vld [vmem:[#allocation5 + $0xb0] sm:$0xff]  ;;  %v65_v9 = vld [vmem:[#allocation5 + $0xb8] sm:$0xff]  ;;  %v66_v11 = vld [vmem:[#allocation5 + $0xc0] sm:$0xff] }
  0x30   :  { %517 = vmatprep.subr.bf16.mxu1 %v649_v0  ;;  %v542_v10 = vpack.c.bf16 %v65_v9, %v64_v8  ;;  %v67_v12 = vld [vmem:[#allocation5 + $0xc8] sm:$0xff]  ;;  %v69_v15 = vld [vmem:[#allocation5 + $0xd8] sm:$0xff] }
  0x31   :  { %537 = vmatpush3.bf16.msra.mxu0 %v536_v4  ;;  %v545_v13 = vpack.c.bf16 %v67_v12, %v66_v11  ;;  %v71_v18 = vld [vmem:[#allocation5 + $0xe8] sm:$0xff]  ;;  %v73_v21 = vld [vmem:[#allocation5 + $0xf8] sm:$0xff] }
  0x32   :  { %538 = vmatprep.subr.bf16.mxu0 %v649_v0  ;;  %v75_v24 = vld [vmem:[#allocation5 + $0x108] sm:$0xff] }
  0x33   :  { %519 = vmatpush3.bf16.msra.mxu1 %v518_v14  ;;  %v68_v14 = vld [vmem:[#allocation5 + $0xd0] sm:$0xff] }
  0x34   :  { %520 = vmatprep.subr.bf16.mxu1 %v649_v0  ;;  %v548_v16 = vpack.c.bf16 %v69_v15, %v68_v14 }
  0x35   :  { %540 = vmatpush3.bf16.msra.mxu0 %v539_v7 }
  0x36   :  { %541 = vmatprep.subr.bf16.mxu0 %v649_v0 }
  0x37   :  { %522 = vmatpush3.bf16.msra.mxu1 %v521_v17  ;;  %v70_v17 = vld [vmem:[#allocation5 + $0xe0] sm:$0xff] }
  0x38   :  { %523 = vmatprep.subr.bf16.mxu1 %v649_v0  ;;  %v551_v19 = vpack.c.bf16 %v71_v18, %v70_v17 }
  0x39   :  { %543 = vmatpush3.bf16.msra.mxu0 %v542_v10 }
  0x3a   :  { %544 = vmatprep.subr.bf16.mxu0 %v649_v0 }
  0x3b   :  { %525 = vmatpush3.bf16.msra.mxu1 %v524_v20  ;;  %v72_v20 = vld [vmem:[#allocation5 + $0xf0] sm:$0xff] }
  0x3c   :  { %526 = vmatprep.subr.bf16.mxu1 %v649_v0  ;;  %v554_v22 = vpack.c.bf16 %v73_v21, %v72_v20 }
  0x3d   :  { %546 = vmatpush3.bf16.msra.mxu0 %v545_v13 }
  0x3e   :  { %547 = vmatprep.subr.bf16.mxu0 %v649_v0 }
  0x3f   :  { %528 = vmatpush3.bf16.msra.mxu1 %v527_v23  ;;  %v74_v23 = vld [vmem:[#allocation5 + $0x100] sm:$0xff] }
  0x40   :  { %529 = vmatprep.subr.bf16.mxu1 %v649_v0  ;;  %v557_v25 = vpack.c.bf16 %v75_v24, %v74_v23 }
  0x41   :  { %549 = vmatpush3.bf16.msra.mxu0 %v548_v16 }
  0x42   :  { %550 = vmatprep.subr.bf16.mxu0 %v649_v0 }
  0x43   :  { %531 = vmatpush3.bf16.msra.mxu1 %v530_v26 }
  0x44   :  { %532 = vmatprep.subr.bf16.mxu1 %v649_v0 }
  0x45   :  { %552 = vmatpush3.bf16.msra.mxu0 %v551_v19 }
  0x46   :  { %553 = vmatprep.subr.bf16.mxu0 %v649_v0 }
  0x47   :  { %534 = vmatpush3.bf16.msra.mxu1 %v533_v29 }
  0x49   :  { %555 = vmatpush3.bf16.msra.mxu0 %v554_v22 }
  0x4a   :  { %556 = vmatprep.subr.bf16.mxu0 %v649_v0 }
  0x4d   :  { %558 = vmatpush3.bf16.msra.mxu0 %v557_v25 }
 0x100   :  { %v151_v30 = vpop.f32.mrb[0].mxu0 }
 0x101   :  { %v155_v31 = vmul.f32 %v151_v30, %v151_v30  ;;  %v156_v32 = vrot.slane %v151_v30, 4  ;;  %v437_v33 = vpop.f32.mrb[1].mxu0 }
 0x103   :  { %v157_v34 = vadd.f32 %v156_v32, %v151_v30  ;;  %v162_v35 = vrot.slane %v155_v31, 4 }
 0x105   :  { %v158_v36 = vrot.slane %v157_v34, 2  ;;  %v163_v37 = vadd.f32 %v162_v35, %v155_v31 }
 0x107   :  { %v159_v38 = vadd.f32 %v158_v36, %v157_v34  ;;  %v164_v39 = vrot.slane %v163_v37, 2 }
 0x109   :  { %v160_v40 = vrot.slane %v159_v38, 1  ;;  %v165_v41 = vadd.f32 %v164_v39, %v163_v37 }
 0x10b   :  { %v161_v42 = vadd.f32 %v160_v40, %v159_v38  ;;  %v166_v43 = vrot.slane %v165_v41, 1 }
 0x10d   :  { %v167_v44 = vadd.f32 %v166_v43, %v165_v41  ;;  %v169_v45 = vmul.f32 0.125, %v161_v42 }
 0x10f   :  { %v170_v46 = vmul.f32 0.125, %v167_v44  ;;  %v171_v47 = vmul.f32 %v169_v45, %v169_v45 }
 0x111   :  { %v172_v48 = vsub.f32 %v170_v46, %v171_v47  ;;  %v78_v46 = vld [vmem:[%s756_s2 + $0x2] sm:$0x1] }
 0x113   :  { %v173_v49 = vmax.f32 %v172_v48, 0.0 }
 0x115   :  { %v174_v50 = vadd.f32 1e-05, %v173_v49  ;;  %v79_v49 = vld [vmem:[%s756_s2 + $0x3] sm:$0x1] }
 0x117   :  { %567 = vrsqrt.f32 %v174_v50 }
 0x121   :  { %v568_v55 = vpop.eup %567 }
 0x122   :  { %v176_v56 = vmul.f32 %v568_v55, %v76_v53 }
 0x124   :  { %v182_v58 = vrot.slane %v176_v56, %v717_v54  ;;  %v177_v59 = vmul.f32 %v176_v56, %v169_v45 }
 0x126   :  { %v178_v60 = vsub.f32 %v77_v57, %v177_v59  ;;  %v183_v61 = vmul.f32 %v182_v58, %v151_v30  ;;  %v393_v58 = vld [vmem:[%s756_s2 + $0x4] ss:$0 sm:$0xff] }
 0x128   :  { %v188_v62 = vrot.slane %v178_v60, %v717_v54 }
 0x12a   :  { %v190_v63 = vadd.f32 %v188_v62, %v183_v61 }
 0x12c   :  { %v191_v1 = vmax.f32 %v190_v63, 0.0 }
 0x12e   :  { %471 = vmatmul.mubr.f32.vlgmr.msra.gmra.mrb[0].mxu1 %v191_v1 }
 0x201   :  { %v258_v26 = vpop.f32.mrb[0].mxu1 }
 0x202   :  { %v262_v27 = vmul.f32 %v258_v26, %v258_v26  ;;  %v263_v28 = vrot.slane %v258_v26, 4  ;;  %v472_v29 = vpop.f32.mrb[1].mxu1 }
 0x204   :  { %v264_v30 = vadd.f32 %v263_v28, %v258_v26  ;;  %v269_v31 = vrot.slane %v262_v27, 4 }
 0x206   :  { %v265_v32 = vrot.slane %v264_v30, 2  ;;  %v270_v33 = vadd.f32 %v269_v31, %v262_v27 }
 0x208   :  { %v266_v34 = vadd.f32 %v265_v32, %v264_v30  ;;  %v271_v35 = vrot.slane %v270_v33, 2 }
 0x20a   :  { %v267_v36 = vrot.slane %v266_v34, 1  ;;  %v272_v37 = vadd.f32 %v271_v35, %v270_v33 }
 0x20c   :  { %v268_v38 = vadd.f32 %v267_v36, %v266_v34  ;;  %v273_v39 = vrot.slane %v272_v37, 1 }
 0x20e   :  { %v274_v40 = vadd.f32 %v273_v39, %v272_v37  ;;  %v275_v0 = vmul.f32 0.125, %v268_v38 }
 0x210   :  { %v276_v41 = vmul.f32 0.125, %v274_v40  ;;  %v277_v42 = vmul.f32 %v275_v0, %v275_v0 }
 0x212   :  { %v278_v43 = vsub.f32 %v276_v41, %v277_v42 }
 0x214   :  { %v279_v44 = vmax.f32 %v278_v43, 0.0 }
 0x216   :  { %v280_v45 = vadd.f32 1e-05, %v279_v44 }
 0x218   :  { %569 = vrsqrt.f32 %v280_v45 }
 0x222   :  { %v570_v47 = vpop.eup %569 }
 0x223   :  { %v282_v48 = vmul.f32 %v570_v47, %v78_v46 }
 0x225   :  { %v283_v50 = vmul.f32 %v282_v48, %v275_v0  ;;  %v288_v51 = vrot.slane %v282_v48, %v717_v54 }
 0x227   :  { %v284_v52 = vsub.f32 %v79_v49, %v283_v50  ;;  %v289_v53 = vmul.f32 %v288_v51, %v258_v26 }
 0x229   :  { %v294_v55 = vrot.slane %v284_v52, %v717_v54 }
 0x22b   :  { %v296_v56 = vadd.f32 %v294_v55, %v289_v53 }
 0x22d   :  { %v297_v57 = vmax.f32 %v296_v56, 0.0 }
 0x22f   :  { %506 = vmatmul.mubr.f32.vlgmr.msra.gmra.mrb[2].mxu0 %v297_v57 }
 0x302   :  { %v370_v59 = vpop.f32.mrb[2].mxu0 }
 0x303   :  { %v371_v60 = vadd.f32 %v393_v58, %v370_v59  ;;  %v507_v61 = vpop.f32.mrb[3].mxu0 }
 0x305   :  { %571 = vtanh.f32 %v371_v60 }
 0x30f   :  { %v572_v62 = vpop.eup %571 }
 0x310   :  { %375 = vst [vmem:[#allocation7] sm:$0xff] %v572_v62 }
 0x311   :  { %628 = shalt.err (!%p625_p6)
}
 0x312   :  { %s629_s2 = scalar_lea.hbm %s757_s3, 128 }
 0x313   :  { %p630_p7 = scmp.ne.s32.totalorder %s757_s3, %s629_s2  ;;  %p633_p8 = scmp.lt.u32.totalorder %s629_s2, %s757_s3 }
 0x315   :  { %p635_p9 = pnand %p633_p8, %p630_p7 }
 0x317   :  { %638 = shalt.err (!%p635_p9)
}
 0x318   :  { %385 = dma.vmem_to_hbm [thread:$0]  %s383_s20, 128, %s757_s3, [#allocation4]  }
 0x319   :  { %643 = dma.done.wait [#allocation4], 128  }
 0x31a   :  { %644 = vsyncadd [#allocation4], 4294967168 }
 0x31b   :  { %389 = vsyncpa [#allocation3], 1 }
 0x31c   :  { %390 = vsyncpa [#allocation6], 1 }
 0x31d   :  { %391 = vsyncpa [#allocation4], 1 }

</bundles_post_ra>
